<compile_context>
chip_gen: v5e
topology: v5e:2x2
jax: 0.10.0
libtpu: 0.0.40
codegen_flags: <defaults>
</compile_context>

<pallas_src>
import jax
import jax.numpy as jnp
from jax.experimental import pallas as pl
from jax.experimental.pallas import tpu as pltpu


LANE = 128          # lane grain for H / V padding
BATCH_GRAIN = 16    # bf16-native sublane grain for the padded batch (also covers f32's 8)
VMEM_LIMIT = 48 * 1024 * 1024   # below v7x's 64 MiB physical, above v5e/v6e scoped defaults


def _round_up(x, m):
    return ((x + m - 1) // m) * m


def _pick_time_chunk(S, cap=32):
    """Largest divisor of S that is <= cap (bounds per-chunk VMEM residency)."""
    for ts in range(min(S, cap), 0, -1):
        if S % ts == 0:
            return ts
    return S


# -----------------------------------------------------------------------------
# Kernel 1: sequential RNN recurrence. grid=(S//Ts,), in-kernel loop over Ts.
# h is carried across grid steps in the resident hN output block.
# -----------------------------------------------------------------------------
def _rnn_recurrence_kernel(xw_ref,    # (Ts, Bp, Hp) f32 : pre-gathered one_hot(x) @ W_ih^T
                           h0_ref,    # (Bp, Hp)     f32
                           whh_ref,   # (Hp, Hp)     f32 : W_hh^T
                           bias_ref,  # (1, Hp)      f32 : b_ih + b_hh
                           y_ref,     # (Ts, Bp, Hp) bf16 out (written back per chunk)
                           hN_ref):   # (Bp, Hp)     f32  out (resident carry)
    Ts, Bp, Hp = y_ref.shape

    @pl.when(pl.program_id(0) == 0)
    def _():
        hN_ref[...] = h0_ref[...]

    # Hoist loop-invariant loads / broadcasts off the serial per-step chain.
    whh = whh_ref[...]
    bias = jnp.broadcast_to(bias_ref[...], (Bp, Hp))

    def step(t, h):
        pre = xw_ref[t] + jnp.dot(h, whh, preferred_element_type=jnp.float32) + bias
        h_new = jnp.tanh(pre)
        y_ref[t] = h_new.astype(y_ref.dtype)
        return h_new

    # Full unroll only for short chunks; modest unroll otherwise (keeps LLO
    # visibility without vreg spills on the serial chain).
    unroll = True if Ts <= 8 else 8
    hN_ref[...] = jax.lax.fori_loop(0, Ts, step, hN_ref[...], unroll=unroll)


def _run_recurrence(Xw, h0_pad, W_hh_T, bias2, Ts):
    S, Bp, Hp = Xw.shape
    return pl.pallas_call(
        _rnn_recurrence_kernel,
        out_shape=(jax.ShapeDtypeStruct((S, Bp, Hp), jnp.bfloat16),
                   jax.ShapeDtypeStruct((Bp, Hp), jnp.float32)),
        grid_spec=pltpu.PrefetchScalarGridSpec(
            num_scalar_prefetch=0,
            grid=(S // Ts,),
            in_specs=[
                pl.BlockSpec((Ts, Bp, Hp), lambda t: (t, 0, 0)),   # Xw time chunk
                pl.BlockSpec((Bp, Hp), lambda t: (0, 0)),          # h0
                pl.BlockSpec((Hp, Hp), lambda t: (0, 0)),          # W_hh^T
                pl.BlockSpec((1, Hp), lambda t: (0, 0)),           # b_ih + b_hh
            ],
            out_specs=[
                pl.BlockSpec((Ts, Bp, Hp), lambda t: (t, 0, 0)),   # Y chunk
                pl.BlockSpec((Bp, Hp), lambda t: (0, 0)),          # hN (resident)
            ],
        ),
        compiler_params=pltpu.CompilerParams(
            dimension_semantics=("arbitrary",),     # recurrence is sequential
            vmem_limit_bytes=VMEM_LIMIT),
    )(Xw, h0_pad, W_hh_T, bias2)


# -----------------------------------------------------------------------------
# Kernel 2: decoder projection — independent tiled MXU matmul (bf16 in, f32 out).
# -----------------------------------------------------------------------------
def _decoder_kernel_small_k(y_ref, w_ref, b_ref, o_ref):
    # Whole H per tile: no reduction axis, no f32 accumulator scratch.
    o_ref[...] = (jnp.dot(y_ref[...], w_ref[...], preferred_element_type=jnp.float32)
                  + b_ref[...])


def _decoder_kernel_tiled_k(y_ref, w_ref, b_ref, o_ref, acc_ref):
    @pl.when(pl.program_id(2) == 0)
    def _():
        acc_ref[...] = jnp.zeros_like(acc_ref)

    acc_ref[...] += jnp.dot(y_ref[...], w_ref[...], preferred_element_type=jnp.float32)

    @pl.when(pl.program_id(2) == pl.num_programs(2) - 1)
    def _():
        o_ref[...] = acc_ref[...] + b_ref[...]


def _run_decoder(Y2, W_out_T, b_out2):
    Mp, Hp = Y2.shape
    Vp = W_out_T.shape[1]
    # Big M tiles amortize per-grid-step overhead; Mp was pre-padded by the wrapper.
    tm = next((t for t in (512, 256, 128) if Mp % t == 0), Mp)
    tn = 256 if Vp % 256 == 0 else 128          # always lane-dense output stores

    if Hp <= 2048:
        return pl.pallas_call(
            _decoder_kernel_small_k,
            out_shape=jax.ShapeDtypeStruct((Mp, Vp), jnp.float32),
            grid_spec=pltpu.PrefetchScalarGridSpec(
                num_scalar_prefetch=0,
                grid=(Mp // tm, Vp // tn),
                in_specs=[
                    pl.BlockSpec((tm, Hp), lambda i, j: (i, 0)),   # Y tile (bf16)
                    pl.BlockSpec((Hp, tn), lambda i, j: (0, j)),   # W_out^T tile (bf16)
                    pl.BlockSpec((1, tn), lambda i, j: (0, j)),    # b_out tile
                ],
                out_specs=pl.BlockSpec((tm, tn), lambda i, j: (i, j)),
            ),
            compiler_params=pltpu.CompilerParams(
                dimension_semantics=("parallel", "parallel"),
                vmem_limit_bytes=VMEM_LIMIT),
        )(Y2, W_out_T, b_out2)

    tk = 256 if Hp % 256 == 0 else 128
    return pl.pallas_call(
        _decoder_kernel_tiled_k,
        out_shape=jax.ShapeDtypeStruct((Mp, Vp), jnp.float32),
        grid_spec=pltpu.PrefetchScalarGridSpec(
            num_scalar_prefetch=0,
            grid=(Mp // tm, Vp // tn, Hp // tk),
            in_specs=[
                pl.BlockSpec((tm, tk), lambda i, j, k: (i, k)),
                pl.BlockSpec((tk, tn), lambda i, j, k: (k, j)),
                pl.BlockSpec((1, tn), lambda i, j, k: (0, j)),
            ],
            out_specs=pl.BlockSpec((tm, tn), lambda i, j, k: (i, j)),
            scratch_shapes=[pltpu.VMEM((tm, tn), jnp.float32)],
        ),
        compiler_params=pltpu.CompilerParams(
            dimension_semantics=("parallel", "parallel", "arbitrary"),
            vmem_limit_bytes=VMEM_LIMIT),
    )(Y2, W_out_T, b_out2)


# -----------------------------------------------------------------------------
# Wrapper: matches RNNModel.forward(inputs, state) -> (output, state)
# -----------------------------------------------------------------------------
def rnn_model_forward(tokens, h0, params):
    """tokens: (batch, seq) int32; h0: (1, batch, hidden) f32.
    Returns (output (seq*batch, vocab) f32, state (1, batch, hidden) f32)."""
    W_ih, W_hh, b_ih, b_hh, W_out, b_out = (
        params["W_ih"], params["W_hh"], params["b_ih"],
        params["b_hh"], params["W_out"], params["b_out"])
    H, V = W_ih.shape
    B, S = tokens.shape
    Bp = _round_up(B, BATCH_GRAIN)
    Hp = _round_up(H, LANE)
    Vp = _round_up(V, LANE)

    # ---- weight prep (once, wrapper-side): transpose, pad H/V to lane grain ----
    W_ih_T = jnp.zeros((V, Hp), jnp.float32).at[:, :H].set(W_ih.T)
    W_hh_T = jnp.zeros((Hp, Hp), jnp.float32).at[:H, :H].set(W_hh.T)
    bias2 = jnp.zeros((1, Hp), jnp.float32).at[0, :H].set(b_ih + b_hh)
    W_out_T = jnp.zeros((Hp, Vp), jnp.bfloat16).at[:H, :V].set(
        W_out.T.astype(jnp.bfloat16))
    b_out2 = jnp.zeros((1, Vp), jnp.float32).at[0, :V].set(b_out)

    # ---- pre-gather the one-hot matmul: one_hot(x_t) @ W_ih^T == W_ih^T[x_t] ----
    # Done wrapper-side (XLA embedding lookup) so the serial recurrence carries
    # no per-step gather work and W_ih^T never enters kernel VMEM.
    Xw = jnp.take(W_ih_T, tokens.T.astype(jnp.int32), axis=0)        # (S, B, Hp)
    Xw = jnp.zeros((S, Bp, Hp), jnp.float32).at[:, :B, :].set(Xw)

    h0_pad = jnp.zeros((Bp, Hp), jnp.float32).at[:B, :H].set(h0[0])

    # 1) sequential recurrence, time-chunked grid.
    Ts = _pick_time_chunk(S)
    Y_pad, hN_pad = _run_recurrence(Xw, h0_pad, W_hh_T, bias2, Ts)

    # 2) decoder: drop padded batch rows BEFORE the matmul, pad rows to the tile
    #    grain, then a fully parallel tiled (M, Hp) @ (Hp, Vp) MXU matmul.
    M = S * B
    Y2 = Y_pad[:, :B, :].reshape(M, Hp)
    tm_grain = 512 if M >= 512 else (256 if M >= 256 else (128 if M >= 128 else 8))
    Mp = _round_up(M, tm_grain)
    if Mp != M:
        Y2 = jnp.zeros((Mp, Hp), jnp.bfloat16).at[:M, :].set(Y2)
    logits_pad = _run_decoder(Y2, W_out_T, b_out2)

    # Un-pad; keep PyTorch's (seq*batch, vocab) row ordering (seq-major).
    output = logits_pad[:M, :V]
    state = hN_pad[:B, :H][None, :, :]
    return output, state


def make_params(key, vocab, hidden):
    ks = jax.random.split(key, 6)
    s = 1.0 / jnp.sqrt(hidden)
    return {
        "W_ih": jax.random.uniform(ks[0], (hidden, vocab), jnp.float32, -s, s),
        "W_hh": jax.random.uniform(ks[1], (hidden, hidden), jnp.float32, -s, s),
        "b_ih": jax.random.uniform(ks[2], (hidden,), jnp.float32, -s, s),
        "b_hh": jax.random.uniform(ks[3], (hidden,), jnp.float32, -s, s),
        "W_out": jax.random.uniform(ks[4], (vocab, hidden), jnp.float32, -s, s),
        "b_out": jax.random.uniform(ks[5], (vocab,), jnp.float32, -s, s),
    }


def reference_forward(tokens, h0, params):
    """Pure-JAX reference mirroring the PyTorch module. The recurrence is full
    f32 (same as the kernel); the decoder rounds Y and W_out to bf16 exactly as
    the kernel's bf16 MXU operands (f32 accumulation)."""
    V = params["W_ih"].shape[1]
    X = jax.nn.one_hot(tokens.T, V, dtype=jnp.float32)
    h = h0[0]

    def step(h, x_t):
        h_new = jnp.tanh(x_t @ params["W_ih"].T + params["b_ih"]
                         + h @ params["W_hh"].T + params["b_hh"])
        return h_new, h_new

    hN, Y = jax.lax.scan(step, h, X)
    Y_bf = Y.reshape(-1, Y.shape[-1]).astype(jnp.bfloat16).astype(jnp.float32)
    W_out_bf = params["W_out"].astype(jnp.bfloat16).astype(jnp.float32)
    out = Y_bf @ W_out_bf.T + params["b_out"]
    return out, hN[None]


if __name__ == "__main__":
    batch, seq, vocab, hidden = 2, 8, 32, 32
    key = jax.random.PRNGKey(0)
    k_tok, k_par = jax.random.split(key)

    tokens = jax.random.randint(k_tok, (batch, seq), 0, vocab, dtype=jnp.int32)
    params = make_params(k_par, vocab, hidden)
    h0 = jnp.zeros((1, batch, hidden), jnp.float32)   # begin_state

    out, state = rnn_model_forward(tokens, h0, params)
    out, state = jax.block_until_ready((out, state))

    ref_out, ref_state = reference_forward(tokens, h0, params)
    assert out.shape == (seq * batch, vocab)
    assert state.shape == (1, batch, hidden)
    # Recurrence is f32; decoder uses bf16 MXU operands (matched in the reference).
    assert jnp.allclose(out, ref_out, atol=2e-2, rtol=2e-2)
    assert jnp.allclose(state, ref_state, atol=2e-2, rtol=2e-2)

    print("KERNEL_OK")
</pallas_src>

<mosaic_0001>
module attributes {stable_mosaic.version = 11 : i64} {
  func.func @_rnn_recurrence_kernel(%arg0: i32, %arg1: memref<8x16x128xf32, #tpu.memory_space<vmem>>, %arg2: memref<16x128xf32, #tpu.memory_space<vmem>>, %arg3: memref<128x128xf32, #tpu.memory_space<vmem>>, %arg4: memref<1x128xf32, #tpu.memory_space<vmem>>, %arg5: memref<8x16x128xbf16, #tpu.memory_space<vmem>>, %arg6: memref<16x128xf32, #tpu.memory_space<vmem>>) attributes {dimension_semantics = [#tpu.dimension_semantics<arbitrary>], iteration_bounds = array<i64: 1>, scalar_prefetch = 0 : i64, scratch_operands = 0 : i64, tpu.core_type = #tpu.core_type<tc>, window_params = [{transform_indices = @transform_0, window_bounds = array<i64: 8, 16, 128>}, {pipeline_mode = #tpu.pipeline_mode<synchronous>, transform_indices = @transform_1, window_bounds = array<i64: 16, 128>}, {pipeline_mode = #tpu.pipeline_mode<synchronous>, transform_indices = @transform_2, window_bounds = array<i64: 128, 128>}, {pipeline_mode = #tpu.pipeline_mode<synchronous>, transform_indices = @transform_3, window_bounds = array<i64: 1, 128>}, {transform_indices = @transform_4, window_bounds = array<i64: 8, 16, 128>}, {pipeline_mode = #tpu.pipeline_mode<synchronous>, transform_indices = @transform_5, window_bounds = array<i64: 16, 128>}]} {
    %c0_i32 = arith.constant 0 : i32
    %0 = arith.cmpi eq, %arg0, %c0_i32 : i32
    %1 = arith.extui %0 : i1 to i32
    %c0_i32_0 = arith.constant 0 : i32
    %2 = arith.cmpi ne, %1, %c0_i32_0 : i32
    scf.if %2 {
      %c0_48 = arith.constant 0 : index
      %c0_49 = arith.constant 0 : index
      %105 = vector.load %arg2[%c0_48, %c0_49] : memref<16x128xf32, #tpu.memory_space<vmem>>, vector<16x128xf32>
      %c0_50 = arith.constant 0 : index
      %c0_51 = arith.constant 0 : index
      %106 = vector.load %arg6[%c0_50, %c0_51] : memref<16x128xf32, #tpu.memory_space<vmem>>, vector<16x128xf32>
      tpu.vector_store %arg6[%c0_50, %c0_51], %105 {strides = array<i32>} : memref<16x128xf32, #tpu.memory_space<vmem>>, vector<16x128xf32>,
    } else {
    }
    %c0 = arith.constant 0 : index
    %c0_1 = arith.constant 0 : index
    %3 = vector.load %arg3[%c0, %c0_1] : memref<128x128xf32, #tpu.memory_space<vmem>>, vector<128x128xf32>
    %c0_2 = arith.constant 0 : index
    %c0_3 = arith.constant 0 : index
    %4 = vector.load %arg4[%c0_2, %c0_3] : memref<1x128xf32, #tpu.memory_space<vmem>>, vector<1x128xf32>
    %5 = vector.shape_cast %4 : vector<1x128xf32> to vector<1x128xf32>
    %6 = vector.broadcast %5 : vector<1x128xf32> to vector<16x128xf32>
    %c0_4 = arith.constant 0 : index
    %c0_5 = arith.constant 0 : index
    %7 = vector.load %arg6[%c0_4, %c0_5] : memref<16x128xf32, #tpu.memory_space<vmem>>, vector<16x128xf32>
    %c0_i32_6 = arith.constant 0 : i32
    %8 = arith.index_cast %c0_i32_6 : i32 to index
    %c0_7 = arith.constant 0 : index
    %c0_8 = arith.constant 0 : index
    %9 = vector.load %arg1[%8, %c0_7, %c0_8] : memref<8x16x128xf32, #tpu.memory_space<vmem>>, vector<1x16x128xf32>
    %10 = vector.shape_cast %9 : vector<1x16x128xf32> to vector<16x128xf32>
    %cst = arith.constant dense<0.000000e+00> : vector<16x128xf32>
    %11 = tpu.matmul %7, %3, %cst {dimension_numbers = #tpu.dot_dimension_numbers<[1], [0], [0], [1], [0, 0, 1, 1], [], []>} : vector<16x128xf32>, vector<128x128xf32>, vector<16x128xf32> -> vector<16x128xf32>
    %12 = arith.addf %10, %11 : vector<16x128xf32>
    %13 = arith.addf %12, %6 : vector<16x128xf32>
    %14 = math.tanh %13 : vector<16x128xf32>
    %15 = arith.truncf %14 : vector<16x128xf32> to vector<16x128xbf16>
    %16 = arith.index_cast %c0_i32_6 : i32 to index
    %c0_9 = arith.constant 0 : index
    %c0_10 = arith.constant 0 : index
    %17 = vector.load %arg5[%16, %c0_9, %c0_10] : memref<8x16x128xbf16, #tpu.memory_space<vmem>>, vector<1x16x128xbf16>
    %18 = vector.shape_cast %17 : vector<1x16x128xbf16> to vector<16x128xbf16>
    %19 = vector.shape_cast %15 : vector<16x128xbf16> to vector<1x16x128xbf16>
    tpu.vector_store %arg5[%16, %c0_9, %c0_10], %19 {strides = array<i32>} : memref<8x16x128xbf16, #tpu.memory_space<vmem>>, vector<1x16x128xbf16>,
    %c1_i32 = arith.constant 1 : i32
    %20 = arith.index_cast %c1_i32 : i32 to index
    %c0_11 = arith.constant 0 : index
    %c0_12 = arith.constant 0 : index
    %21 = vector.load %arg1[%20, %c0_11, %c0_12] : memref<8x16x128xf32, #tpu.memory_space<vmem>>, vector<1x16x128xf32>
    %22 = vector.shape_cast %21 : vector<1x16x128xf32> to vector<16x128xf32>
    %cst_13 = arith.constant dense<0.000000e+00> : vector<16x128xf32>
    %23 = tpu.matmul %14, %3, %cst_13 {dimension_numbers = #tpu.dot_dimension_numbers<[1], [0], [0], [1], [0, 0, 1, 1], [], []>} : vector<16x128xf32>, vector<128x128xf32>, vector<16x128xf32> -> vector<16x128xf32>
    %24 = arith.addf %22, %23 : vector<16x128xf32>
    %25 = arith.addf %24, %6 : vector<16x128xf32>
    %26 = math.tanh %25 : vector<16x128xf32>
    %27 = arith.truncf %26 : vector<16x128xf32> to vector<16x128xbf16>
    %28 = arith.index_cast %c1_i32 : i32 to index
    %c0_14 = arith.constant 0 : index
    %c0_15 = arith.constant 0 : index
    %29 = vector.load %arg5[%28, %c0_14, %c0_15] : memref<8x16x128xbf16, #tpu.memory_space<vmem>>, vector<1x16x128xbf16>
    %30 = vector.shape_cast %29 : vector<1x16x128xbf16> to vector<16x128xbf16>
    %31 = vector.shape_cast %27 : vector<16x128xbf16> to vector<1x16x128xbf16>
    tpu.vector_store %arg5[%28, %c0_14, %c0_15], %31 {strides = array<i32>} : memref<8x16x128xbf16, #tpu.memory_space<vmem>>, vector<1x16x128xbf16>,
    %c2_i32 = arith.constant 2 : i32
    %32 = arith.index_cast %c2_i32 : i32 to index
    %c0_16 = arith.constant 0 : index
    %c0_17 = arith.constant 0 : index
    %33 = vector.load %arg1[%32, %c0_16, %c0_17] : memref<8x16x128xf32, #tpu.memory_space<vmem>>, vector<1x16x128xf32>
    %34 = vector.shape_cast %33 : vector<1x16x128xf32> to vector<16x128xf32>
    %cst_18 = arith.constant dense<0.000000e+00> : vector<16x128xf32>
    %35 = tpu.matmul %26, %3, %cst_18 {dimension_numbers = #tpu.dot_dimension_numbers<[1], [0], [0], [1], [0, 0, 1, 1], [], []>} : vector<16x128xf32>, vector<128x128xf32>, vector<16x128xf32> -> vector<16x128xf32>
    %36 = arith.addf %34, %35 : vector<16x128xf32>
    %37 = arith.addf %36, %6 : vector<16x128xf32>
    %38 = math.tanh %37 : vector<16x128xf32>
    %39 = arith.truncf %38 : vector<16x128xf32> to vector<16x128xbf16>
    %40 = arith.index_cast %c2_i32 : i32 to index
    %c0_19 = arith.constant 0 : index
    %c0_20 = arith.constant 0 : index
    %41 = vector.load %arg5[%40, %c0_19, %c0_20] : memref<8x16x128xbf16, #tpu.memory_space<vmem>>, vector<1x16x128xbf16>
    %42 = vector.shape_cast %41 : vector<1x16x128xbf16> to vector<16x128xbf16>
    %43 = vector.shape_cast %39 : vector<16x128xbf16> to vector<1x16x128xbf16>
    tpu.vector_store %arg5[%40, %c0_19, %c0_20], %43 {strides = array<i32>} : memref<8x16x128xbf16, #tpu.memory_space<vmem>>, vector<1x16x128xbf16>,
    %c3_i32 = arith.constant 3 : i32
    %44 = arith.index_cast %c3_i32 : i32 to index
    %c0_21 = arith.constant 0 : index
    %c0_22 = arith.constant 0 : index
    %45 = vector.load %arg1[%44, %c0_21, %c0_22] : memref<8x16x128xf32, #tpu.memory_space<vmem>>, vector<1x16x128xf32>
    %46 = vector.shape_cast %45 : vector<1x16x128xf32> to vector<16x128xf32>
    %cst_23 = arith.constant dense<0.000000e+00> : vector<16x128xf32>
    %47 = tpu.matmul %38, %3, %cst_23 {dimension_numbers = #tpu.dot_dimension_numbers<[1], [0], [0], [1], [0, 0, 1, 1], [], []>} : vector<16x128xf32>, vector<128x128xf32>, vector<16x128xf32> -> vector<16x128xf32>
    %48 = arith.addf %46, %47 : vector<16x128xf32>
    %49 = arith.addf %48, %6 : vector<16x128xf32>
    %50 = math.tanh %49 : vector<16x128xf32>
    %51 = arith.truncf %50 : vector<16x128xf32> to vector<16x128xbf16>
    %52 = arith.index_cast %c3_i32 : i32 to index
    %c0_24 = arith.constant 0 : index
    %c0_25 = arith.constant 0 : index
    %53 = vector.load %arg5[%52, %c0_24, %c0_25] : memref<8x16x128xbf16, #tpu.memory_space<vmem>>, vector<1x16x128xbf16>
    %54 = vector.shape_cast %53 : vector<1x16x128xbf16> to vector<16x128xbf16>
    %55 = vector.shape_cast %51 : vector<16x128xbf16> to vector<1x16x128xbf16>
    tpu.vector_store %arg5[%52, %c0_24, %c0_25], %55 {strides = array<i32>} : memref<8x16x128xbf16, #tpu.memory_space<vmem>>, vector<1x16x128xbf16>,
    %c4_i32 = arith.constant 4 : i32
    %56 = arith.index_cast %c4_i32 : i32 to index
    %c0_26 = arith.constant 0 : index
    %c0_27 = arith.constant 0 : index
    %57 = vector.load %arg1[%56, %c0_26, %c0_27] : memref<8x16x128xf32, #tpu.memory_space<vmem>>, vector<1x16x128xf32>
    %58 = vector.shape_cast %57 : vector<1x16x128xf32> to vector<16x128xf32>
    %cst_28 = arith.constant dense<0.000000e+00> : vector<16x128xf32>
    %59 = tpu.matmul %50, %3, %cst_28 {dimension_numbers = #tpu.dot_dimension_numbers<[1], [0], [0], [1], [0, 0, 1, 1], [], []>} : vector<16x128xf32>, vector<128x128xf32>, vector<16x128xf32> -> vector<16x128xf32>
    %60 = arith.addf %58, %59 : vector<16x128xf32>
    %61 = arith.addf %60, %6 : vector<16x128xf32>
    %62 = math.tanh %61 : vector<16x128xf32>
    %63 = arith.truncf %62 : vector<16x128xf32> to vector<16x128xbf16>
    %64 = arith.index_cast %c4_i32 : i32 to index
    %c0_29 = arith.constant 0 : index
    %c0_30 = arith.constant 0 : index
    %65 = vector.load %arg5[%64, %c0_29, %c0_30] : memref<8x16x128xbf16, #tpu.memory_space<vmem>>, vector<1x16x128xbf16>
    %66 = vector.shape_cast %65 : vector<1x16x128xbf16> to vector<16x128xbf16>
    %67 = vector.shape_cast %63 : vector<16x128xbf16> to vector<1x16x128xbf16>
    tpu.vector_store %arg5[%64, %c0_29, %c0_30], %67 {strides = array<i32>} : memref<8x16x128xbf16, #tpu.memory_space<vmem>>, vector<1x16x128xbf16>,
    %c5_i32 = arith.constant 5 : i32
    %68 = arith.index_cast %c5_i32 : i32 to index
    %c0_31 = arith.constant 0 : index
    %c0_32 = arith.constant 0 : index
    %69 = vector.load %arg1[%68, %c0_31, %c0_32] : memref<8x16x128xf32, #tpu.memory_space<vmem>>, vector<1x16x128xf32>
    %70 = vector.shape_cast %69 : vector<1x16x128xf32> to vector<16x128xf32>
    %cst_33 = arith.constant dense<0.000000e+00> : vector<16x128xf32>
    %71 = tpu.matmul %62, %3, %cst_33 {dimension_numbers = #tpu.dot_dimension_numbers<[1], [0], [0], [1], [0, 0, 1, 1], [], []>} : vector<16x128xf32>, vector<128x128xf32>, vector<16x128xf32> -> vector<16x128xf32>
    %72 = arith.addf %70, %71 : vector<16x128xf32>
    %73 = arith.addf %72, %6 : vector<16x128xf32>
    %74 = math.tanh %73 : vector<16x128xf32>
    %75 = arith.truncf %74 : vector<16x128xf32> to vector<16x128xbf16>
    %76 = arith.index_cast %c5_i32 : i32 to index
    %c0_34 = arith.constant 0 : index
    %c0_35 = arith.constant 0 : index
    %77 = vector.load %arg5[%76, %c0_34, %c0_35] : memref<8x16x128xbf16, #tpu.memory_space<vmem>>, vector<1x16x128xbf16>
    %78 = vector.shape_cast %77 : vector<1x16x128xbf16> to vector<16x128xbf16>
    %79 = vector.shape_cast %75 : vector<16x128xbf16> to vector<1x16x128xbf16>
    tpu.vector_store %arg5[%76, %c0_34, %c0_35], %79 {strides = array<i32>} : memref<8x16x128xbf16, #tpu.memory_space<vmem>>, vector<1x16x128xbf16>,
    %c6_i32 = arith.constant 6 : i32
    %80 = arith.index_cast %c6_i32 : i32 to index
    %c0_36 = arith.constant 0 : index
    %c0_37 = arith.constant 0 : index
    %81 = vector.load %arg1[%80, %c0_36, %c0_37] : memref<8x16x128xf32, #tpu.memory_space<vmem>>, vector<1x16x128xf32>
    %82 = vector.shape_cast %81 : vector<1x16x128xf32> to vector<16x128xf32>
    %cst_38 = arith.constant dense<0.000000e+00> : vector<16x128xf32>
    %83 = tpu.matmul %74, %3, %cst_38 {dimension_numbers = #tpu.dot_dimension_numbers<[1], [0], [0], [1], [0, 0, 1, 1], [], []>} : vector<16x128xf32>, vector<128x128xf32>, vector<16x128xf32> -> vector<16x128xf32>
    %84 = arith.addf %82, %83 : vector<16x128xf32>
    %85 = arith.addf %84, %6 : vector<16x128xf32>
    %86 = math.tanh %85 : vector<16x128xf32>
    %87 = arith.truncf %86 : vector<16x128xf32> to vector<16x128xbf16>
    %88 = arith.index_cast %c6_i32 : i32 to index
    %c0_39 = arith.constant 0 : index
    %c0_40 = arith.constant 0 : index
    %89 = vector.load %arg5[%88, %c0_39, %c0_40] : memref<8x16x128xbf16, #tpu.memory_space<vmem>>, vector<1x16x128xbf16>
    %90 = vector.shape_cast %89 : vector<1x16x128xbf16> to vector<16x128xbf16>
    %91 = vector.shape_cast %87 : vector<16x128xbf16> to vector<1x16x128xbf16>
    tpu.vector_store %arg5[%88, %c0_39, %c0_40], %91 {strides = array<i32>} : memref<8x16x128xbf16, #tpu.memory_space<vmem>>, vector<1x16x128xbf16>,
    %c7_i32 = arith.constant 7 : i32
    %92 = arith.index_cast %c7_i32 : i32 to index
    %c0_41 = arith.constant 0 : index
    %c0_42 = arith.constant 0 : index
    %93 = vector.load %arg1[%92, %c0_41, %c0_42] : memref<8x16x128xf32, #tpu.memory_space<vmem>>, vector<1x16x128xf32>
    %94 = vector.shape_cast %93 : vector<1x16x128xf32> to vector<16x128xf32>
    %cst_43 = arith.constant dense<0.000000e+00> : vector<16x128xf32>
    %95 = tpu.matmul %86, %3, %cst_43 {dimension_numbers = #tpu.dot_dimension_numbers<[1], [0], [0], [1], [0, 0, 1, 1], [], []>} : vector<16x128xf32>, vector<128x128xf32>, vector<16x128xf32> -> vector<16x128xf32>
    %96 = arith.addf %94, %95 : vector<16x128xf32>
    %97 = arith.addf %96, %6 : vector<16x128xf32>
    %98 = math.tanh %97 : vector<16x128xf32>
    %99 = arith.truncf %98 : vector<16x128xf32> to vector<16x128xbf16>
    %100 = arith.index_cast %c7_i32 : i32 to index
    %c0_44 = arith.constant 0 : index
    %c0_45 = arith.constant 0 : index
    %101 = vector.load %arg5[%100, %c0_44, %c0_45] : memref<8x16x128xbf16, #tpu.memory_space<vmem>>, vector<1x16x128xbf16>
    %102 = vector.shape_cast %101 : vector<1x16x128xbf16> to vector<16x128xbf16>
    %103 = vector.shape_cast %99 : vector<16x128xbf16> to vector<1x16x128xbf16>
    tpu.vector_store %arg5[%100, %c0_44, %c0_45], %103 {strides = array<i32>} : memref<8x16x128xbf16, #tpu.memory_space<vmem>>, vector<1x16x128xbf16>,
    %c8_i32 = arith.constant 8 : i32
    %c0_46 = arith.constant 0 : index
    %c0_47 = arith.constant 0 : index
    %104 = vector.load %arg6[%c0_46, %c0_47] : memref<16x128xf32, #tpu.memory_space<vmem>>, vector<16x128xf32>
    tpu.vector_store %arg6[%c0_46, %c0_47], %98 {strides = array<i32>} : memref<16x128xf32, #tpu.memory_space<vmem>>, vector<16x128xf32>,
    return
  }
  func.func @transform_0(%arg0: i32) -> (i32, i32, i32) {
    %c0_i32 = arith.constant 0 : i32
    %c0_i32_0 = arith.constant 0 : i32
    %c0_i32_1 = arith.constant 0 : i32
    return %arg0, %c0_i32, %c0_i32_0 : i32, i32, i32
  }
  func.func @transform_1(%arg0: i32) -> (i32, i32) {
    %c0_i32 = arith.constant 0 : i32
    %c0_i32_0 = arith.constant 0 : i32
    %c0_i32_1 = arith.constant 0 : i32
    return %c0_i32, %c0_i32_0 : i32, i32
  }
  func.func @transform_2(%arg0: i32) -> (i32, i32) {
    %c0_i32 = arith.constant 0 : i32
    %c0_i32_0 = arith.constant 0 : i32
    %c0_i32_1 = arith.constant 0 : i32
    return %c0_i32, %c0_i32_0 : i32, i32
  }
  func.func @transform_3(%arg0: i32) -> (i32, i32) {
    %c0_i32 = arith.constant 0 : i32
    %c0_i32_0 = arith.constant 0 : i32
    %c0_i32_1 = arith.constant 0 : i32
    return %c0_i32, %c0_i32_0 : i32, i32
  }
  func.func @transform_4(%arg0: i32) -> (i32, i32, i32) {
    %c0_i32 = arith.constant 0 : i32
    %c0_i32_0 = arith.constant 0 : i32
    %c0_i32_1 = arith.constant 0 : i32
    return %arg0, %c0_i32, %c0_i32_0 : i32, i32, i32
  }
  func.func @transform_5(%arg0: i32) -> (i32, i32) {
    %c0_i32 = arith.constant 0 : i32
    %c0_i32_0 = arith.constant 0 : i32
    %c0_i32_1 = arith.constant 0 : i32
    return %c0_i32, %c0_i32_0 : i32, i32
  }
}

</mosaic_0001>

<bundles_post_ra>
// kernel: tpu_custom_call.1
= control target key start
LH: loop header
LB: loop body
LE: loop exit
PB: predicated region body
PF: predicated region fallthrough
CT: control target
= control target key end

     0   :  { %11 = vsyncpa [#allocation3], 0  ;;  %s889_s0 = inlined_call_operand.hbm [shape: f32[8,16,128], index: 0, kind: input, shape index: {}]   ;;  %s890_s1 = inlined_call_operand.hbm [shape: f32[16,128], index: 1, kind: input, shape index: {}]   ;;  %s891_s2 = inlined_call_operand.hbm [shape: f32[128,128], index: 2, kind: input, shape index: {}]   ;;  %s892_s3 = inlined_call_operand.vmem [shape: f32[1,128], index: 3, kind: input, shape index: {}]   ;;  %s893_s4 = inlined_call_operand.hbm [shape: bf16[8,16,128], index: 4, kind: output, shape index: {0}]   ;;  %s894_s5 = inlined_call_operand.hbm [shape: f32[16,128], index: 5, kind: output, shape index: {1}]  }
   0x1   :  { %12 = vsyncpa [#allocation6], 0 }
   0x2   :  { %13 = vsyncpa [#allocation4], 0 }
   0x3   :  { %14 = vsyncpa [#allocation10], 0  ;;  %s32_s20 = sshll.u32 %s890_s1, 4  ;;  %s642_s21 = smov [#allocation5]   ;;  %s33_s20 = int_to_ptr.hbm [resolvable:$true] %s32_s20 }
   0x4   :  { %s34_s22 = sshll.u32 %s642_s21, 4  ;;  %s19_s25 = sshll.u32 %s889_s0, 4  ;;  %s35_s22 = int_to_ptr.vmem [resolvable:$true] %s34_s22  ;;  %s20_s25 = int_to_ptr.hbm [resolvable:$true] %s19_s25 }
   0x5   :  { %s643_s26 = smov 128   ;;  %s644_s27 = smov 8  }
   0x6   :  { %40 = dma.hbm_to_vmem [thread:$0]  %s33_s20, 256, %s35_s22, [#allocation6], %s643_s26, %s643_s26, %s644_s27  }
   0x7   :  { %s645_s28 = smov [#allocation2]   ;;  %s45_s1 = sshll.u32 %s891_s2, 4  ;;  %s46_s1 = int_to_ptr.hbm [resolvable:$true] %s45_s1 }
   0x8   :  { %s21_s29 = sshll.u32 %s645_s28, 4  ;;  %s646_s0 = smov [#allocation7]   ;;  %s22_s29 = int_to_ptr.vmem [resolvable:$true] %s21_s29 }
   0x9   :  { %27 = dma.hbm_to_vmem [thread:$0]  %s20_s25, 2048, %s22_s29, [#allocation3], %s643_s26, %s643_s26, %s644_s27  }
   0xa   :  { %s47_s7 = sshll.u32 %s646_s0, 4  ;;  %s48_s7 = int_to_ptr.vmem [resolvable:$true] %s47_s7 }
   0xb   :  { %53 = dma.hbm_to_vmem [thread:$0]  %s46_s1, 2048, %s48_s7, [#allocation6], %s643_s26, %s643_s26, %s644_s27  }
   0xc   :  { %634 = dma.done.wait [#allocation3], 2048  }
   0xd   :  { %635 = vsyncadd [#allocation3], 4294965248 }
   0xe   :  { %636 = dma.done.wait [#allocation6], 2304  }
   0xf   :  { %637 = vsyncadd [#allocation6], 4294964992  ;;  %v699_v0 = vld [vmem:[#allocation7 + $0x78] sm:$0xff]  ;;  %v701_v1 = vld [vmem:[#allocation7 + $0x70] sm:$0xff]  ;;  %s413_s12 = sshll.u32 %s894_s5, 4  ;;  %s648_s13 = smov [#allocation8]   ;;  %s414_s12 = int_to_ptr.hbm [resolvable:$true] %s413_s12 }
  0x10   :  { %100 = vmatpush.msra.mxu0 %v699_v0  ;;  %136 = vmatpush.msra.mxu1 %v699_v0  ;;  %v705_v2 = vld [vmem:[#allocation7 + $0x68] sm:$0xff]  ;;  %v711_v3 = vld [vmem:[#allocation7 + $0x60] sm:$0xff]  ;;  %v717_v4 = vld [vmem:[#allocation7 + $0x58] sm:$0xff]  ;;  %s398_s14 = sshll.u32 %s648_s13, 4  ;;  %s400_s17 = sshll.u32 %s893_s4, 4  ;;  %s399_s14 = int_to_ptr.vmem [resolvable:$true] %s398_s14  ;;  %s401_s17 = int_to_ptr.hbm [resolvable:$true] %s400_s17 }
  0x11   :  { %173 = vmatpush.msra.mxu2 %v699_v0  ;;  %210 = vmatpush.msra.mxu3 %v699_v0  ;;  %v723_v5 = vld [vmem:[#allocation7 + $0x50] sm:$0xff]  ;;  %v729_v6 = vld [vmem:[#allocation7 + $0x48] sm:$0xff]  ;;  %v735_v7 = vld [vmem:[#allocation7 + $0x40] sm:$0xff]  ;;  %s649_s18 = smov 64   ;;  %s650_s5 = smov 4  }
  0x12   :  { %101 = vmatpush.msra.mxu0 %v701_v1  ;;  %137 = vmatpush.msra.mxu1 %v701_v1  ;;  %v741_v8 = vld [vmem:[#allocation7 + $0x38] sm:$0xff]  ;;  %v747_v9 = vld [vmem:[#allocation7 + $0x30] sm:$0xff]  ;;  %v753_v10 = vld [vmem:[#allocation7 + $0x28] sm:$0xff] }
  0x13   :  { %174 = vmatpush.msra.mxu2 %v701_v1  ;;  %211 = vmatpush.msra.mxu3 %v701_v1  ;;  %v759_v11 = vld [vmem:[#allocation7 + $0x20] sm:$0xff]  ;;  %v765_v12 = vld [vmem:[#allocation7 + $0x18] sm:$0xff]  ;;  %v771_v13 = vld [vmem:[#allocation7 + $0x10] sm:$0xff] }
  0x14   :  { %102 = vmatpush.msra.mxu0 %v705_v2  ;;  %138 = vmatpush.msra.mxu1 %v705_v2  ;;  %v777_v14 = vld [vmem:[#allocation7 + $0x8] sm:$0xff]  ;;  %v783_v15 = vld [vmem:[#allocation7] sm:$0xff]  ;;  %v72_v16 = vld [vmem:[#allocation5] sm:$0xff] }
  0x15   :  { %175 = vmatpush.msra.mxu2 %v705_v2  ;;  %212 = vmatpush.msra.mxu3 %v705_v2  ;;  %v73_v17 = vld [vmem:[#allocation5 + $0x8] sm:$0xff]  ;;  %v98_v18 = vld [vmem:[#allocation2] sm:$0xff]  ;;  %v134_v30 = vld [vmem:[#allocation2 + $0x10] sm:$0xff] }
  0x16   :  { %103 = vmatpush.msra.mxu0 %v711_v3  ;;  %139 = vmatpush.msra.mxu1 %v711_v3  ;;  %v862_v19 = vld [vmem:[%s892_s3] ss:$0 sm:$0xff]  ;;  %v99_v23 = vld [vmem:[#allocation2 + $0x8] sm:$0xff]  ;;  %v135_v34 = vld [vmem:[#allocation2 + $0x18] sm:$0xff]  ;;  %s647_s3 = smov [#allocation9]  }
  0x17   :  { %176 = vmatpush.msra.mxu2 %v711_v3  ;;  %213 = vmatpush.msra.mxu3 %v711_v3  ;;  %v171_v41 = vld [vmem:[#allocation2 + $0x20] sm:$0xff]  ;;  %v172_v45 = vld [vmem:[#allocation2 + $0x28] sm:$0xff]  ;;  %v208_v52 = vld [vmem:[#allocation2 + $0x30] sm:$0xff]  ;;  %s411_s9 = sshll.u32 %s647_s3, 4  ;;  %s412_s9 = int_to_ptr.vmem [resolvable:$true] %s411_s9 }
  0x18   :  { %104 = vmatpush.msra.mxu0 %v717_v4  ;;  %140 = vmatpush.msra.mxu1 %v717_v4  ;;  %v209_v56 = vld [vmem:[#allocation2 + $0x38] sm:$0xff]  ;;  %v245_v63 = vld [vmem:[#allocation2 + $0x40] sm:$0xff] }
  0x19   :  { %177 = vmatpush.msra.mxu2 %v717_v4  ;;  %214 = vmatpush.msra.mxu3 %v717_v4 }
  0x1a   :  { %105 = vmatpush.msra.mxu0 %v723_v5  ;;  %141 = vmatpush.msra.mxu1 %v723_v5 }
  0x1b   :  { %178 = vmatpush.msra.mxu2 %v723_v5  ;;  %215 = vmatpush.msra.mxu3 %v723_v5 }
  0x1c   :  { %106 = vmatpush.msra.mxu0 %v729_v6  ;;  %142 = vmatpush.msra.mxu1 %v729_v6 }
  0x1d   :  { %179 = vmatpush.msra.mxu2 %v729_v6  ;;  %216 = vmatpush.msra.mxu3 %v729_v6 }
  0x1e   :  { %107 = vmatpush.msra.mxu0 %v735_v7  ;;  %143 = vmatpush.msra.mxu1 %v735_v7 }
  0x1f   :  { %180 = vmatpush.msra.mxu2 %v735_v7  ;;  %217 = vmatpush.msra.mxu3 %v735_v7 }
  0x20   :  { %108 = vmatpush.msra.mxu0 %v741_v8  ;;  %144 = vmatpush.msra.mxu1 %v741_v8 }
  0x21   :  { %181 = vmatpush.msra.mxu2 %v741_v8  ;;  %218 = vmatpush.msra.mxu3 %v741_v8 }
  0x22   :  { %109 = vmatpush.msra.mxu0 %v747_v9  ;;  %145 = vmatpush.msra.mxu1 %v747_v9 }
  0x23   :  { %182 = vmatpush.msra.mxu2 %v747_v9  ;;  %219 = vmatpush.msra.mxu3 %v747_v9 }
  0x24   :  { %110 = vmatpush.msra.mxu0 %v753_v10  ;;  %146 = vmatpush.msra.mxu1 %v753_v10 }
  0x25   :  { %183 = vmatpush.msra.mxu2 %v753_v10  ;;  %220 = vmatpush.msra.mxu3 %v753_v10 }
  0x26   :  { %111 = vmatpush.msra.mxu0 %v759_v11  ;;  %147 = vmatpush.msra.mxu1 %v759_v11 }
  0x27   :  { %184 = vmatpush.msra.mxu2 %v759_v11  ;;  %221 = vmatpush.msra.mxu3 %v759_v11 }
  0x28   :  { %112 = vmatpush.msra.mxu0 %v765_v12  ;;  %148 = vmatpush.msra.mxu1 %v765_v12 }
  0x29   :  { %185 = vmatpush.msra.mxu2 %v765_v12  ;;  %222 = vmatpush.msra.mxu3 %v765_v12 }
  0x2a   :  { %113 = vmatpush.msra.mxu0 %v771_v13  ;;  %149 = vmatpush.msra.mxu1 %v771_v13 }
  0x2b   :  { %186 = vmatpush.msra.mxu2 %v771_v13  ;;  %223 = vmatpush.msra.mxu3 %v771_v13 }
  0x2c   :  { %114 = vmatpush.msra.mxu0 %v777_v14  ;;  %150 = vmatpush.msra.mxu1 %v777_v14 }
  0x2d   :  { %187 = vmatpush.msra.mxu2 %v777_v14  ;;  %224 = vmatpush.msra.mxu3 %v777_v14 }
  0x2e   :  { %115 = vmatpush.msra.mxu0 %v783_v15  ;;  %151 = vmatpush.msra.mxu1 %v783_v15 }
  0x2f   :  { %116 = vmatmul.f32.vlgmr.msra.gmra.mxu0 %v72_v16  ;;  %188 = vmatpush.msra.mxu2 %v783_v15 }
  0x30   :  { %225 = vmatpush.msra.mxu3 %v783_v15  ;;  %247 = vmatpush.msrb.mxu0 %v699_v0 }
  0x31   :  { %284 = vmatpush.msrb.mxu1 %v699_v0  ;;  %321 = vmatpush.msrb.mxu2 %v699_v0 }
  0x32   :  { %248 = vmatpush.msrb.mxu0 %v701_v1  ;;  %358 = vmatpush.msrb.mxu3 %v699_v0 }
  0x33   :  { %285 = vmatpush.msrb.mxu1 %v701_v1  ;;  %322 = vmatpush.msrb.mxu2 %v701_v1 }
  0x34   :  { %249 = vmatpush.msrb.mxu0 %v705_v2  ;;  %359 = vmatpush.msrb.mxu3 %v701_v1 }
  0x35   :  { %286 = vmatpush.msrb.mxu1 %v705_v2  ;;  %323 = vmatpush.msrb.mxu2 %v705_v2 }
  0x36   :  { %250 = vmatpush.msrb.mxu0 %v711_v3  ;;  %360 = vmatpush.msrb.mxu3 %v705_v2 }
  0x37   :  { %119 = vmatmul.f32.gmra.mxu0 %v73_v17  ;;  %287 = vmatpush.msrb.mxu1 %v711_v3 }
  0x38   :  { %251 = vmatpush.msrb.mxu0 %v717_v4  ;;  %324 = vmatpush.msrb.mxu2 %v711_v3 }
  0x39   :  { %288 = vmatpush.msrb.mxu1 %v717_v4  ;;  %361 = vmatpush.msrb.mxu3 %v711_v3  ;;  %v246_v3 = vld [vmem:[#allocation2 + $0x48] sm:$0xff] }
  0x3a   :  { %252 = vmatpush.msrb.mxu0 %v723_v5  ;;  %325 = vmatpush.msrb.mxu2 %v717_v4 }
  0x3b   :  { %289 = vmatpush.msrb.mxu1 %v723_v5  ;;  %362 = vmatpush.msrb.mxu3 %v717_v4 }
  0x3c   :  { %253 = vmatpush.msrb.mxu0 %v729_v6  ;;  %326 = vmatpush.msrb.mxu2 %v723_v5 }
  0x3d   :  { %290 = vmatpush.msrb.mxu1 %v729_v6  ;;  %363 = vmatpush.msrb.mxu3 %v723_v5 }
  0x3e   :  { %254 = vmatpush.msrb.mxu0 %v735_v7  ;;  %327 = vmatpush.msrb.mxu2 %v729_v6 }
  0x3f   :  { %291 = vmatpush.msrb.mxu1 %v735_v7  ;;  %364 = vmatpush.msrb.mxu3 %v729_v6 }
  0x40   :  { %255 = vmatpush.msrb.mxu0 %v741_v8  ;;  %328 = vmatpush.msrb.mxu2 %v735_v7 }
  0x41   :  { %292 = vmatpush.msrb.mxu1 %v741_v8  ;;  %365 = vmatpush.msrb.mxu3 %v735_v7 }
  0x42   :  { %256 = vmatpush.msrb.mxu0 %v747_v9  ;;  %329 = vmatpush.msrb.mxu2 %v741_v8 }
  0x43   :  { %293 = vmatpush.msrb.mxu1 %v747_v9  ;;  %366 = vmatpush.msrb.mxu3 %v741_v8 }
  0x44   :  { %257 = vmatpush.msrb.mxu0 %v753_v10  ;;  %330 = vmatpush.msrb.mxu2 %v747_v9 }
  0x45   :  { %294 = vmatpush.msrb.mxu1 %v753_v10  ;;  %367 = vmatpush.msrb.mxu3 %v747_v9 }
  0x46   :  { %258 = vmatpush.msrb.mxu0 %v759_v11  ;;  %331 = vmatpush.msrb.mxu2 %v753_v10 }
  0x47   :  { %295 = vmatpush.msrb.mxu1 %v759_v11  ;;  %368 = vmatpush.msrb.mxu3 %v753_v10  ;;  %v282_v10 = vld [vmem:[#allocation2 + $0x50] sm:$0xff] }
  0x48   :  { %259 = vmatpush.msrb.mxu0 %v765_v12  ;;  %332 = vmatpush.msrb.mxu2 %v759_v11 }
  0x49   :  { %296 = vmatpush.msrb.mxu1 %v765_v12  ;;  %369 = vmatpush.msrb.mxu3 %v759_v11 }
  0x4a   :  { %260 = vmatpush.msrb.mxu0 %v771_v13  ;;  %333 = vmatpush.msrb.mxu2 %v765_v12 }
  0x4b   :  { %297 = vmatpush.msrb.mxu1 %v771_v13  ;;  %370 = vmatpush.msrb.mxu3 %v765_v12 }
  0x4c   :  { %261 = vmatpush.msrb.mxu0 %v777_v14  ;;  %334 = vmatpush.msrb.mxu2 %v771_v13 }
  0x4d   :  { %298 = vmatpush.msrb.mxu1 %v777_v14  ;;  %371 = vmatpush.msrb.mxu3 %v771_v13 }
  0x4e   :  { %262 = vmatpush.msrb.mxu0 %v783_v15  ;;  %335 = vmatpush.msrb.mxu2 %v777_v14 }
  0x4f   :  { %299 = vmatpush.msrb.mxu1 %v783_v15  ;;  %372 = vmatpush.msrb.mxu3 %v777_v14  ;;  %v283_v14 = vld [vmem:[#allocation2 + $0x58] sm:$0xff] }
  0x50   :  { %336 = vmatpush.msrb.mxu2 %v783_v15 }
  0x51   :  { %373 = vmatpush.msrb.mxu3 %v783_v15 }
  0xac   :  { %v117_v20 = vpop.f32.mrf.mxu0 }
  0xad   :  { %v123_v21 = vadd.f32 %v117_v20, %v98_v18 }
  0xaf   :  { %v125_v22 = vadd.f32 %v862_v19, %v123_v21 }
  0xb1   :  { %482 = vtanh.f32 %v125_v22  ;;  %v319_v22 = vld [vmem:[#allocation2 + $0x60] sm:$0xff] }
  0xb4   :  { %v120_v24 = vpop.f32.mrf.mxu0 }
  0xb5   :  { %v124_v25 = vadd.f32 %v120_v24, %v99_v23 }
  0xb7   :  { %v483_v26 = vpop.eup %482  ;;  %v126_v27 = vadd.f32 %v862_v19, %v124_v25 }
  0xb8   :  { %152 = vmatmul.f32.vlgmr.msra.gmra.mxu1 %v483_v26 }
  0xb9   :  { %484 = vtanh.f32 %v126_v27 }
  0xbf   :  { %v485_v28 = vpop.eup %484 }
  0xc0   :  { %v435_v29 = vpack.c.bf16 %v485_v28, %v483_v26  ;;  %155 = vmatmul.f32.gmra.mxu1 %v485_v28  ;;  %v320_v26 = vld [vmem:[#allocation2 + $0x68] sm:$0xff] }
  0xc2   :  { %436 = vst [vmem:[#allocation8] sm:$0xff] %v435_v29  }
 0x135   :  { %v153_v31 = vpop.f32.mrf.mxu1 }
 0x136   :  { %v159_v32 = vadd.f32 %v153_v31, %v134_v30 }
 0x138   :  { %v161_v33 = vadd.f32 %v862_v19, %v159_v32 }
 0x13a   :  { %486 = vtanh.f32 %v161_v33  ;;  %v356_v33 = vld [vmem:[#allocation2 + $0x70] sm:$0xff] }
 0x13d   :  { %v156_v35 = vpop.f32.mrf.mxu1 }
 0x13e   :  { %v160_v36 = vadd.f32 %v156_v35, %v135_v34 }
 0x140   :  { %v487_v37 = vpop.eup %486  ;;  %v162_v38 = vadd.f32 %v862_v19, %v160_v36 }
 0x141   :  { %189 = vmatmul.f32.vlgmr.msra.gmra.mxu2 %v487_v37 }
 0x142   :  { %488 = vtanh.f32 %v162_v38 }
 0x148   :  { %v489_v39 = vpop.eup %488 }
 0x149   :  { %v440_v40 = vpack.c.bf16 %v489_v39, %v487_v37  ;;  %192 = vmatmul.f32.gmra.mxu2 %v489_v39  ;;  %v357_v37 = vld [vmem:[#allocation2 + $0x78] sm:$0xff] }
 0x14b   :  { %441 = vst [vmem:[#allocation8 + $0x8] sm:$0xff] %v440_v40  }
 0x1c4   :  { %v190_v42 = vpop.f32.mrf.mxu2 }
 0x1c5   :  { %v196_v43 = vadd.f32 %v190_v42, %v171_v41 }
 0x1c7   :  { %v198_v44 = vadd.f32 %v862_v19, %v196_v43 }
 0x1c9   :  { %490 = vtanh.f32 %v198_v44 }
 0x1cc   :  { %v193_v46 = vpop.f32.mrf.mxu2 }
 0x1cd   :  { %v197_v47 = vadd.f32 %v193_v46, %v172_v45 }
 0x1cf   :  { %v491_v48 = vpop.eup %490  ;;  %v199_v49 = vadd.f32 %v862_v19, %v197_v47 }
 0x1d0   :  { %226 = vmatmul.f32.vlgmr.msra.gmra.mxu3 %v491_v48 }
 0x1d1   :  { %492 = vtanh.f32 %v199_v49 }
 0x1d7   :  { %v493_v50 = vpop.eup %492 }
 0x1d8   :  { %v445_v51 = vpack.c.bf16 %v493_v50, %v491_v48  ;;  %229 = vmatmul.f32.gmra.mxu3 %v493_v50 }
 0x1da   :  { %446 = vst [vmem:[#allocation8 + $0x10] sm:$0xff] %v445_v51  }
 0x253   :  { %v227_v53 = vpop.f32.mrf.mxu3 }
 0x254   :  { %v233_v54 = vadd.f32 %v227_v53, %v208_v52 }
 0x256   :  { %v235_v55 = vadd.f32 %v862_v19, %v233_v54 }
 0x258   :  { %494 = vtanh.f32 %v235_v55 }
 0x25b   :  { %v230_v57 = vpop.f32.mrf.mxu3 }
 0x25c   :  { %v234_v58 = vadd.f32 %v230_v57, %v209_v56 }
 0x25e   :  { %v495_v59 = vpop.eup %494  ;;  %v236_v60 = vadd.f32 %v862_v19, %v234_v58 }
 0x25f   :  { %263 = vmatmul.f32.vlgmr.msrb.gmra.mxu0 %v495_v59 }
 0x260   :  { %496 = vtanh.f32 %v236_v60 }
 0x266   :  { %v497_v61 = vpop.eup %496 }
 0x267   :  { %v450_v62 = vpack.c.bf16 %v497_v61, %v495_v59  ;;  %266 = vmatmul.f32.gmra.mxu0 %v497_v61 }
 0x269   :  { %451 = vst [vmem:[#allocation8 + $0x18] sm:$0xff] %v450_v62  }
 0x2dc   :  { %v264_v0 = vpop.f32.mrf.mxu0 }
 0x2dd   :  { %v270_v1 = vadd.f32 %v264_v0, %v245_v63 }
 0x2df   :  { %v272_v2 = vadd.f32 %v862_v19, %v270_v1 }
 0x2e1   :  { %498 = vtanh.f32 %v272_v2 }
 0x2e4   :  { %v267_v4 = vpop.f32.mrf.mxu0 }
 0x2e5   :  { %v271_v5 = vadd.f32 %v267_v4, %v246_v3 }
 0x2e7   :  { %v499_v6 = vpop.eup %498  ;;  %v273_v7 = vadd.f32 %v862_v19, %v271_v5 }
 0x2e8   :  { %300 = vmatmul.f32.vlgmr.msrb.gmra.mxu1 %v499_v6 }
 0x2e9   :  { %500 = vtanh.f32 %v273_v7 }
 0x2ef   :  { %v501_v8 = vpop.eup %500 }
 0x2f0   :  { %v455_v9 = vpack.c.bf16 %v501_v8, %v499_v6  ;;  %303 = vmatmul.f32.gmra.mxu1 %v501_v8 }
 0x2f2   :  { %456 = vst [vmem:[#allocation8 + $0x20] sm:$0xff] %v455_v9  }
 0x365   :  { %v301_v11 = vpop.f32.mrf.mxu1 }
 0x366   :  { %v307_v12 = vadd.f32 %v301_v11, %v282_v10 }
 0x368   :  { %v309_v13 = vadd.f32 %v862_v19, %v307_v12 }
 0x36a   :  { %502 = vtanh.f32 %v309_v13 }
 0x36d   :  { %v304_v15 = vpop.f32.mrf.mxu1 }
 0x36e   :  { %v308_v16 = vadd.f32 %v304_v15, %v283_v14 }
 0x370   :  { %v503_v17 = vpop.eup %502  ;;  %v310_v18 = vadd.f32 %v862_v19, %v308_v16 }
 0x371   :  { %337 = vmatmul.f32.vlgmr.msrb.gmra.mxu2 %v503_v17 }
 0x372   :  { %504 = vtanh.f32 %v310_v18 }
 0x378   :  { %v505_v20 = vpop.eup %504 }
 0x379   :  { %v460_v21 = vpack.c.bf16 %v505_v20, %v503_v17  ;;  %340 = vmatmul.f32.gmra.mxu2 %v505_v20 }
 0x37b   :  { %461 = vst [vmem:[#allocation8 + $0x28] sm:$0xff] %v460_v21  }
 0x3f4   :  { %v338_v23 = vpop.f32.mrf.mxu2 }
 0x3f5   :  { %v344_v24 = vadd.f32 %v338_v23, %v319_v22 }
 0x3f7   :  { %v346_v25 = vadd.f32 %v862_v19, %v344_v24 }
 0x3f9   :  { %506 = vtanh.f32 %v346_v25 }
 0x3fc   :  { %v341_v27 = vpop.f32.mrf.mxu2 }
 0x3fd   :  { %v345_v28 = vadd.f32 %v341_v27, %v320_v26 }
 0x3ff   :  { %v507_v29 = vpop.eup %506  ;;  %v347_v30 = vadd.f32 %v862_v19, %v345_v28 }
 0x400   :  { %374 = vmatmul.f32.vlgmr.msrb.gmra.mxu3 %v507_v29 }
 0x401   :  { %508 = vtanh.f32 %v347_v30 }
 0x407   :  { %v509_v31 = vpop.eup %508 }
 0x408   :  { %v465_v32 = vpack.c.bf16 %v509_v31, %v507_v29  ;;  %377 = vmatmul.f32.gmra.mxu3 %v509_v31 }
 0x40a   :  { %466 = vst [vmem:[#allocation8 + $0x30] sm:$0xff] %v465_v32  }
 0x483   :  { %v375_v34 = vpop.f32.mrf.mxu3 }
 0x484   :  { %v381_v35 = vadd.f32 %v375_v34, %v356_v33 }
 0x486   :  { %v383_v36 = vadd.f32 %v862_v19, %v381_v35 }
 0x488   :  { %510 = vtanh.f32 %v383_v36 }
 0x48b   :  { %v378_v38 = vpop.f32.mrf.mxu3 }
 0x48c   :  { %v382_v39 = vadd.f32 %v378_v38, %v357_v37 }
 0x48e   :  { %v511_v40 = vpop.eup %510  ;;  %v384_v41 = vadd.f32 %v862_v19, %v382_v39 }
 0x48f   :  { %392 = vst [vmem:[#allocation9] sm:$0xff] %v511_v40 }
 0x490   :  { %512 = vtanh.f32 %v384_v41 }
 0x496   :  { %v513_v42 = vpop.eup %512 }
 0x497   :  { %v470_v19 = vpack.c.bf16 %v513_v42, %v511_v40  ;;  %393 = vst [vmem:[#allocation9 + $0x8] sm:$0xff] %v513_v42 }
 0x498   :  { %419 = dma.vmem_to_hbm [thread:$0]  %s412_s9, 256, %s414_s12, [#allocation10], %s643_s26, %s643_s26, %s644_s27  }
 0x499   :  { %471 = vst [vmem:[#allocation8 + $0x38] sm:$0xff] %v470_v19  }
 0x49a   :  { %406 = dma.vmem_to_hbm [thread:$0]  %s399_s14, 1024, %s401_s17, [#allocation4], %s649_s18, %s649_s18, %s650_s5  }
 0x49b   :  { %638 = dma.done.wait [#allocation4], 1024  }
 0x49c   :  { %639 = vsyncadd [#allocation4], 4294966272 }
 0x49d   :  { %640 = dma.done.wait [#allocation10], 256  }
 0x49e   :  { %641 = vsyncadd [#allocation10], 4294967040 }
 0x49f   :  { %428 = vsyncpa [#allocation3], 1 }
 0x4a0   :  { %429 = vsyncpa [#allocation6], 1 }
 0x4a1   :  { %430 = vsyncpa [#allocation4], 1 }
 0x4a2   :  { %431 = vsyncpa [#allocation10], 1 }

</bundles_post_ra>
